<compile_context>
chip_gen: v5e
topology: v5e:2x2
jax: 0.10.0
libtpu: 0.0.40
codegen_flags: <defaults>
</compile_context>

<pallas_src>
import jax
import jax.numpy as jnp
from jax.experimental import pallas as pl
from jax.experimental.pallas import tpu as pltpu


def _vfe_kernel(feat_ref, sel_ref, npts_ref, out_ref):
    """One tile of folded voxel rows.

    feat_ref: (TR, g*K)  flattened features, g voxels per lane-dense row
    sel_ref : (g*K, g*F) constant block-diagonal 0/1 selector (bf16)
    npts_ref: (TR, g*F)  per-voxel valid point counts broadcast over F (f32)
    out_ref : (TR, g*F)  per-voxel mean features
    """
    feat = feat_ref[...]
    sel = sel_ref[...]
    if feat.dtype == jnp.float32:
        # bf16 hi/lo split: two native bf16 MXU passes with ~f32 accuracy
        # (selector entries are exact 0/1, accumulation is f32).
        hi = feat.astype(jnp.bfloat16)
        lo = (feat - hi.astype(jnp.float32)).astype(jnp.bfloat16)
        summed = (jnp.dot(hi, sel, preferred_element_type=jnp.float32)
                  + jnp.dot(lo, sel, preferred_element_type=jnp.float32))
    else:
        summed = jnp.dot(feat, sel, preferred_element_type=jnp.float32)
    # Exact division (matches the PyTorch reference); operates on the small output
    # tile only, so it is completely hidden under the input DMA.
    out_ref[...] = (summed / npts_ref[...]).astype(out_ref.dtype)


def _round_up(x, m):
    return -(-x // m) * m


def _pick_fold(n, k, f, itemsize):
    """Number of voxels folded into one VMEM row.

    Only divisors of N are considered so the folded (N//g, g*K) view is a free
    reshape (the big feature tensor is never padded/sliced/copied).  g is capped so
    the block-diagonal matmul's arithmetic intensity (~ g*F bf16-FLOP per HBM byte)
    stays well below the v5e HBM roofline (~240 FLOP/B) -> kernel stays mem-bound.
    """
    if n <= 1 or k <= 0:
        return 1
    max_fold = max(1, min(64, 128 // max(f, 1)))
    best_g, best_score = 1, -1.0
    for g in range(1, min(max_fold, n) + 1):
        if n % g:
            continue
        row = g * k
        lane_util = row / _round_up(row, 128)            # 1.0 => no lane padding
        row_len = min(row * itemsize, 4096) / 4096.0     # contiguous-row benefit, saturates at 4 KiB
        score = 2.0 * row_len + lane_util
        if score > best_score + 1e-9:
            best_g, best_score = g, score
    return best_g


def _prefer_even_grid_steps():
    # v7x shards "parallel" grid axes across its 2 TensorCores; an even number of
    # near-equal steps keeps both cores balanced.  Best effort -- defaults to False.
    try:
        kind = jax.devices()[0].device_kind.lower()
    except Exception:
        return False
    return ("v7" in kind) or ("tpu7" in kind)


def _pick_tile_rows(n_rows, row_vmem_bytes, target_bytes, prefer_even_steps):
    """Folded rows per grid step: big DMAs, near-equal (and even on v7x) steps."""
    if n_rows <= 8:
        return max(n_rows, 1)
    tile = max(8, min(n_rows, target_bytes // max(row_vmem_bytes, 1)))
    steps = -(-n_rows // tile)
    if prefer_even_steps and steps > 1 and steps % 2:
        steps += 1                                       # balance the two v7x TensorCores
    tile = _round_up(-(-n_rows // steps), 8)             # near-equal, sublane-aligned steps
    return min(tile, n_rows)


def hard_simple_vfe(features, num_points, coors=None, *, num_features=4,
                    tile_rows=None, fold=None):
    """JAX/Pallas equivalent of mmdet3d's HardSimpleVFE.forward.

    features:   (N, M, C) float array (float32 or bfloat16)
    num_points: (N,)      number of valid points per voxel
    coors:      unused (kept for signature parity with the PyTorch module)
    returns:    (N, num_features) array with dtype == features.dtype
    """
    del coors                                            # not used by the forward pass
    n, m, c = features.shape
    f = int(num_features)
    if not (0 < f <= c):
        raise ValueError("num_features must be in (0, C]")
    if n == 0:
        return jnp.zeros((0, f), dtype=features.dtype)
    if features.dtype not in (jnp.float32, jnp.bfloat16):
        features = features.astype(jnp.float32)
    k = m * c
    itemsize = features.dtype.itemsize

    g = int(fold) if fold is not None else _pick_fold(n, k, f, itemsize)
    if n % g:
        raise ValueError("fold must divide N")
    r = n // g                                           # folded rows
    gk, gf = g * k, g * f

    # Free reshapes only: the big feature tensor is never padded, sliced or transposed.
    feat_fold = features.reshape(r, gk)
    # Per-voxel counts broadcast over the F output channels, folded the same way (tiny).
    npts_fold = jnp.broadcast_to(
        num_points.astype(jnp.float32).reshape(n, 1), (n, f)).reshape(r, gf)
    # TODO(synk): clamp counts to >= 1 if empty voxels can occur; the PyTorch reference
    # divides by zero there, so exact parity is kept instead.

    # Constant block-diagonal selector: sel[gi*K + m*C + ch, gj*F + ff] = (gi==gj)&(ch==ff).
    # One MXU contraction with it sums the M points, picks the first F channels and
    # un-folds the g voxels, while the big operand streams in its natural layout.
    chan = jnp.arange(k, dtype=jnp.int32) % c
    blk = (chan[:, None] == jnp.arange(f, dtype=jnp.int32)[None, :]).astype(jnp.bfloat16)
    eye = jnp.eye(g, dtype=jnp.bfloat16)
    sel = (eye[:, None, :, None] * blk[None, :, None, :]).reshape(gk, gf)

    # Tile sizing: ~4 MiB (f32) / ~6 MiB (bf16) per step.  The f32 budget leaves room
    # for the in-kernel bf16 hi/lo temporaries (~2x tile) on top of the double-buffered
    # input, staying under the explicit 32 MiB scoped-VMEM limit on v5e/v6e/v7x.
    row_vmem_bytes = _round_up(gk, 128) * itemsize
    target_bytes = (4 << 20) if features.dtype == jnp.float32 else (6 << 20)
    if tile_rows is None:
        tile_rows = _pick_tile_rows(r, row_vmem_bytes, target_bytes,
                                    _prefer_even_grid_steps())
    tile_rows = int(tile_rows)
    if tile_rows >= r:
        tile_rows = r                                    # full extent: always legal
    elif tile_rows % 8:
        tile_rows = min(r, _round_up(tile_rows, 8))      # blocks need 8-sublane alignment
    grid = (pl.cdiv(r, tile_rows),)

    out2d = pl.pallas_call(
        _vfe_kernel,
        out_shape=jax.ShapeDtypeStruct((r, gf), features.dtype),
        grid_spec=pltpu.PrefetchScalarGridSpec(
            num_scalar_prefetch=0,
            grid=grid,
            in_specs=[
                pl.BlockSpec((tile_rows, gk), lambda i: (i, 0)),   # big lane-dense tile
                pl.BlockSpec((gk, gf), lambda i: (0, 0)),          # selector (stays resident)
                pl.BlockSpec((tile_rows, gf), lambda i: (i, 0)),   # folded point counts
            ],
            out_specs=pl.BlockSpec((tile_rows, gf), lambda i: (i, 0)),
        ),
        compiler_params=pltpu.CompilerParams(
            dimension_semantics=("parallel",),            # shard row tiles across TCs
            vmem_limit_bytes=32 * 1024 * 1024,
        ),
    )(feat_fold, sel, npts_fold)

    # (R, g*F) -> (N, F): a free row-major collapse, no transpose of anything sizeable.
    return out2d.reshape(n, f)


def _reference(features, num_points, num_features):
    s = features.astype(jnp.float32)[:, :, :num_features].sum(axis=1)
    mean = s / num_points.astype(jnp.float32)[:, None]
    return mean.astype(features.dtype)


if __name__ == "__main__":
    key = jax.random.PRNGKey(0)
    k1, k2, k3, k4, k5, k6 = jax.random.split(key, 6)

    vfe = jax.jit(hard_simple_vfe, static_argnames=("num_features", "tile_rows", "fold"))

    # Case 1: float32, C > num_features, N with a good divisor -> folded fast path (g=25).
    n1, m1, c1, f1 = 200, 8, 5, 4
    feats1 = jax.random.normal(k1, (n1, m1, c1), dtype=jnp.float32)
    npts1 = jax.random.randint(k2, (n1,), 1, m1 + 1, dtype=jnp.int32)
    coors1 = jnp.zeros((n1, 3), dtype=jnp.int32)                    # unused, signature parity
    out1 = jax.block_until_ready(vfe(feats1, npts1, coors1, num_features=f1))
    ref1 = _reference(feats1, npts1, f1)
    assert out1.shape == (n1, f1) and out1.dtype == feats1.dtype
    assert jnp.allclose(out1.astype(jnp.float32), ref1.astype(jnp.float32),
                        rtol=2e-3, atol=2e-3), "float32 folded case mismatch vs reference"

    # Case 2: bfloat16 (half the HBM read traffic), C == num_features, 128-aligned fold (g=32).
    n2, m2, c2, f2 = 256, 16, 4, 4
    feats2 = jax.random.normal(k3, (n2, m2, c2), dtype=jnp.bfloat16)
    npts2 = jax.random.randint(k4, (n2,), 1, m2 + 1, dtype=jnp.int32)
    coors2 = jnp.zeros((n2, 3), dtype=jnp.int32)
    out2 = jax.block_until_ready(vfe(feats2, npts2, coors2, num_features=f2))
    ref2 = _reference(feats2, npts2, f2)
    assert out2.shape == (n2, f2) and out2.dtype == feats2.dtype
    assert jnp.allclose(out2.astype(jnp.float32), ref2.astype(jnp.float32),
                        rtol=2e-2, atol=2e-2), "bfloat16 folded case mismatch vs reference"

    # Case 3: prime N (no usable fold -> g=1 fallback) with a forced multi-step grid,
    # exercising the masked edge block and the parallel grid axis.
    n3, m3, c3, f3 = 211, 8, 5, 4
    feats3 = jax.random.normal(k5, (n3, m3, c3), dtype=jnp.float32)
    npts3 = jax.random.randint(k6, (n3,), 1, m3 + 1, dtype=jnp.int32)
    coors3 = jnp.zeros((n3, 3), dtype=jnp.int32)
    out3 = jax.block_until_ready(vfe(feats3, npts3, coors3, num_features=f3, tile_rows=64))
    ref3 = _reference(feats3, npts3, f3)
    assert out3.shape == (n3, f3) and out3.dtype == feats3.dtype
    assert jnp.allclose(out3.astype(jnp.float32), ref3.astype(jnp.float32),
                        rtol=2e-3, atol=2e-3), "g=1 fallback / edge-block case mismatch"

    print("KERNEL_OK")
</pallas_src>

<mosaic_0001>
module attributes {stable_mosaic.version = 11 : i64} {
  func.func @_vfe_kernel(%arg0: i32, %arg1: memref<8x1000xf32, #tpu.memory_space<vmem>>, %arg2: memref<1000x100xbf16, #tpu.memory_space<vmem>>, %arg3: memref<8x100xf32, #tpu.memory_space<vmem>>, %arg4: memref<8x100xf32, #tpu.memory_space<vmem>>) attributes {dimension_semantics = [#tpu.dimension_semantics<parallel>], iteration_bounds = array<i64: 1>, scalar_prefetch = 0 : i64, scratch_operands = 0 : i64, tpu.core_type = #tpu.core_type<tc>, window_params = [{transform_indices = @transform_0, window_bounds = array<i64: 8, 1000>}, {pipeline_mode = #tpu.pipeline_mode<synchronous>, transform_indices = @transform_1, window_bounds = array<i64: 1000, 100>}, {transform_indices = @transform_2, window_bounds = array<i64: 8, 100>}, {transform_indices = @transform_3, window_bounds = array<i64: 8, 100>}]} {
    %c0 = arith.constant 0 : index
    %c0_0 = arith.constant 0 : index
    %0 = vector.load %arg1[%c0, %c0_0] : memref<8x1000xf32, #tpu.memory_space<vmem>>, vector<8x1000xf32>
    %c0_1 = arith.constant 0 : index
    %c0_2 = arith.constant 0 : index
    %1 = vector.load %arg2[%c0_1, %c0_2] : memref<1000x100xbf16, #tpu.memory_space<vmem>>, vector<1000x100xbf16>
    %2 = arith.truncf %0 : vector<8x1000xf32> to vector<8x1000xbf16>
    %3 = arith.extf %2 : vector<8x1000xbf16> to vector<8x1000xf32>
    %4 = arith.subf %0, %3 : vector<8x1000xf32>
    %5 = arith.truncf %4 : vector<8x1000xf32> to vector<8x1000xbf16>
    %cst = arith.constant dense<0.000000e+00> : vector<8x100xf32>
    %6 = tpu.matmul %2, %1, %cst {dimension_numbers = #tpu.dot_dimension_numbers<[1], [0], [0], [1], [0, 0, 1, 1], [], []>} : vector<8x1000xbf16>, vector<1000x100xbf16>, vector<8x100xf32> -> vector<8x100xf32>
    %cst_3 = arith.constant dense<0.000000e+00> : vector<8x100xf32>
    %7 = tpu.matmul %5, %1, %cst_3 {dimension_numbers = #tpu.dot_dimension_numbers<[1], [0], [0], [1], [0, 0, 1, 1], [], []>} : vector<8x1000xbf16>, vector<1000x100xbf16>, vector<8x100xf32> -> vector<8x100xf32>
    %8 = arith.addf %6, %7 : vector<8x100xf32>
    %c0_4 = arith.constant 0 : index
    %c0_5 = arith.constant 0 : index
    %9 = vector.load %arg3[%c0_4, %c0_5] : memref<8x100xf32, #tpu.memory_space<vmem>>, vector<8x100xf32>
    %10 = arith.divf %8, %9 : vector<8x100xf32>
    %c0_6 = arith.constant 0 : index
    %c0_7 = arith.constant 0 : index
    %11 = vector.load %arg4[%c0_6, %c0_7] : memref<8x100xf32, #tpu.memory_space<vmem>>, vector<8x100xf32>
    tpu.vector_store %arg4[%c0_6, %c0_7], %10 {strides = array<i32>} : memref<8x100xf32, #tpu.memory_space<vmem>>, vector<8x100xf32>,
    return
  }
  func.func @transform_0(%arg0: i32) -> (i32, i32) {
    %c0_i32 = arith.constant 0 : i32
    %c0_i32_0 = arith.constant 0 : i32
    return %arg0, %c0_i32 : i32, i32
  }
  func.func @transform_1(%arg0: i32) -> (i32, i32) {
    %c0_i32 = arith.constant 0 : i32
    %c0_i32_0 = arith.constant 0 : i32
    %c0_i32_1 = arith.constant 0 : i32
    return %c0_i32, %c0_i32_0 : i32, i32
  }
  func.func @transform_2(%arg0: i32) -> (i32, i32) {
    %c0_i32 = arith.constant 0 : i32
    %c0_i32_0 = arith.constant 0 : i32
    return %arg0, %c0_i32 : i32, i32
  }
  func.func @transform_3(%arg0: i32) -> (i32, i32) {
    %c0_i32 = arith.constant 0 : i32
    %c0_i32_0 = arith.constant 0 : i32
    return %arg0, %c0_i32 : i32, i32
  }
}

</mosaic_0001>

<bundles_post_ra>
// kernel: hard_simple_vfe.1
= control target key start
LH: loop header
LB: loop body
LE: loop exit
PB: predicated region body
PF: predicated region fallthrough
CT: control target
= control target key end

     0   :  { %vm555_vm0 = vcmask 1043456   ;;  %vm551_vm1 = vcmask 850944   ;;  %vm813_vm6 = vcmask 818176   ;;  %s1650_s1 = inlined_call_operand.vmem [shape: bf16[1000,100], index: 1, kind: input, shape index: {}]   ;;  %s1651_s0 = inlined_call_operand.vmem [shape: f32[8,1000], index: 0, kind: input, shape index: {}]   ;;  %s1652_s2 = inlined_call_operand.vmem [shape: f32[8,100], index: 2, kind: input, shape index: {}]   ;;  %s1653_s3 = inlined_call_operand.vmem [shape: f32[8,100], index: 3, kind: output, shape index: {}]  }
   0x1   :  { %v1156_v0 = vld [vmem:[%s1650_s1 + $0x38] sm:$0xff]  ;;  %v1178_v4 = vld [vmem:[%s1650_s1 + $0x30] sm:$0xff]  ;;  %v1202_v8 = vld [vmem:[%s1650_s1 + $0x28] sm:$0xff] }
   0x2   :  { %v1161_v1 = vld [vmem:[%s1650_s1 + $0x78] sm:$0xff]  ;;  %559 = vmatpush.bf16.msra.mxu0 %v1156_v0  ;;  %v1183_v5 = vld [vmem:[%s1650_s1 + $0x70] sm:$0xff]  ;;  %v1207_v9 = vld [vmem:[%s1650_s1 + $0x68] sm:$0xff] }
   0x3   :  { %v1166_v2 = vld [vmem:[%s1650_s1 + $0xb8] sm:$0xff]  ;;  %572 = vmatpush.bf16.msra.mxu1 %v1161_v1  ;;  %v1190_v6 = vld [vmem:[%s1650_s1 + $0xb0] sm:$0xff]  ;;  %v1214_v10 = vld [vmem:[%s1650_s1 + $0xa8] sm:$0xff] }
   0x4   :  { %v1171_v3 = vld [vmem:[%s1650_s1 + $0xf8] sm:$0xff]  ;;  %585 = vmatpush.bf16.msra.mxu2 %v1166_v2  ;;  %v1195_v7 = vld [vmem:[%s1650_s1 + $0xf0] sm:$0xff]  ;;  %v1219_v11 = vld [vmem:[%s1650_s1 + $0xe8] sm:$0xff] }
   0x5   :  { %598 = vmatpush.bf16.msra.mxu3 %v1171_v3  ;;  %v1226_v12 = vld [vmem:[%s1650_s1 + $0x20] sm:$0xff]  ;;  %v1250_v16 = vld [vmem:[%s1650_s1 + $0x18] sm:$0xff]  ;;  %v17_v20 = vld [vmem:[%s1651_s0 + $0x10] sm:$0xff] }
   0x6   :  { %560 = vmatpush.bf16.msra.mxu0 %v1178_v4  ;;  %v1231_v13 = vld [vmem:[%s1650_s1 + $0x60] sm:$0xff]  ;;  %v1255_v17 = vld [vmem:[%s1650_s1 + $0x58] sm:$0xff]  ;;  %v1278_v22 = vld [vmem:[%s1650_s1 + $0x10] sm:$0xff] }
   0x7   :  { %573 = vmatpush.bf16.msra.mxu1 %v1183_v5  ;;  %v1238_v14 = vld [vmem:[%s1650_s1 + $0xa0] sm:$0xff]  ;;  %v1262_v18 = vld [vmem:[%s1650_s1 + $0x98] sm:$0xff]  ;;  %v1285_v23 = vld [vmem:[%s1650_s1 + $0x50] sm:$0xff] }
   0x8   :  { %586 = vmatpush.bf16.msra.mxu2 %v1190_v6  ;;  %v1243_v15 = vld [vmem:[%s1650_s1 + $0xe0] sm:$0xff]  ;;  %v1267_v19 = vld [vmem:[%s1650_s1 + $0xd8] sm:$0xff]  ;;  %v16_v26 = vld [vmem:[%s1651_s0 + $0x8] sm:$0xff] }
   0x9   :  { %599 = vmatpush.bf16.msra.mxu3 %v1195_v7  ;;  %v18_v21 = vld [vmem:[%s1651_s0 + $0x18] sm:$0xff]  ;;  %v15_v25 = vld [vmem:[%s1651_s0] sm:$0xff]  ;;  %v1300_v27 = vld [vmem:[%s1650_s1 + $0x90] sm:$0xff] }
   0xa   :  { %561 = vmatpush.bf16.msra.mxu0 %v1202_v8  ;;  %v1287_v24 = vpack.c.bf16 %v18_v21, %v17_v20  ;;  %v1305_v28 = vld [vmem:[%s1650_s1 + $0xd0] sm:$0xff]  ;;  %v1310_v30 = vpack.c.bf16 %v16_v26, %v15_v25  ;;  %v1317_v31 = vld [vmem:[%s1650_s1 + $0x8] sm:$0xff]  ;;  %v1345_v40 = vld [vmem:[%s1650_s1] sm:$0xff] }
   0xb   :  { %574 = vmatpush.bf16.msra.mxu1 %v1207_v9  ;;  %v147_v29 = vld [vmem:[%s1650_s1 + $0x1f0] sm:$0xf]  ;;  %v1322_v32 = vld [vmem:[%s1650_s1 + $0x48] sm:$0xff]  ;;  %v1350_v41 = vld [vmem:[%s1650_s1 + $0x40] sm:$0xff] }
   0xc   :  { %587 = vmatpush.bf16.msra.mxu2 %v1214_v10  ;;  %v425_v33 = vunpack.c.l.b16 %v147_v29  ;;  %v154_v34 = vunpack.c.l.bf16 %v1287_v24  ;;  %v152_v35 = vunpack.c.l.bf16 %v1310_v30  ;;  %v1331_v36 = vld [vmem:[%s1650_s1 + $0x88] sm:$0xff]  ;;  %v155_v38 = vunpack.c.h.bf16 %v1287_v24  ;;  %v1357_v45 = vld [vmem:[%s1650_s1 + $0x80] sm:$0xff]  ;;  %v1367_v49 = vld [vmem:[%s1650_s1 + $0x138] sm:$0xff] }
   0xd   :  { %600 = vmatpush.bf16.msra.mxu3 %v1219_v11  ;;  %v1336_v37 = vld [vmem:[%s1650_s1 + $0xc8] sm:$0xff]  ;;  %v153_v39 = vunpack.c.h.bf16 %v1310_v30  ;;  %v1362_v46 = vld [vmem:[%s1650_s1 + $0xc0] sm:$0xff]  ;;  %v1372_v50 = vld [vmem:[%s1650_s1 + $0x178] sm:$0xff] }
   0xe   :  { %562 = vmatpush.bf16.msra.mxu0 %v1226_v12  ;;  %v488_v42 = vpack.c.b16 %v425_v33, %v425_v33  ;;  %v162_v43 = vsub.f32 %v17_v20, %v154_v34  ;;  %v160_v44 = vsub.f32 %v15_v25, %v152_v35  ;;  %v163_v47 = vsub.f32 %v18_v21, %v155_v38  ;;  %v1377_v51 = vld [vmem:[%s1650_s1 + $0x1b8] sm:$0xff]  ;;  %v1390_v57 = vld [vmem:[%s1650_s1 + $0x130] sm:$0xff]  ;;  %v1407_v60 = vld [vmem:[%s1650_s1 + $0x1e8] sm:$0xff] }
   0xf   :  { %575 = vmatpush.bf16.msra.mxu1 %v1231_v13  ;;  %v161_v48 = vsub.f32 %v16_v26, %v153_v39  ;;  %v1395_v58 = vld [vmem:[%s1650_s1 + $0x170] sm:$0xff]  ;;  %v1414_v61 = vld [vmem:[%s1650_s1 + $0x128] sm:$0xff]  ;;  %v1431_v20 = vld [vmem:[%s1650_s1 + $0x1e0] sm:$0xff] }
  0x10   :  { %588 = vmatpush.bf16.msra.mxu2 %v1238_v14  ;;  %v1381_v52 = vsel %vm555_vm0, %v488_v42, 0  ;;  %v170_v53 = vpack.c.bf16 %v162_v43, %v162_v43  ;;  %v168_v54 = vpack.c.bf16 %v160_v44, %v160_v44  ;;  %v171_v55 = vpack.c.bf16 %v163_v47, %v163_v47  ;;  %v1402_v59 = vld [vmem:[%s1650_s1 + $0x1b0] sm:$0xff]  ;;  %v1419_v62 = vld [vmem:[%s1650_s1 + $0x168] sm:$0xff]  ;;  %1670 = vst [vmem:[#allocation2_spill] sm:$0xff] %v1431_v20  ;;  %v1438_v21 = vld [vmem:[%s1650_s1 + $0x120] sm:$0xff] }
  0x11   :  { %601 = vmatpush.bf16.msra.mxu3 %v1243_v15  ;;  %v169_v56 = vpack.c.bf16 %v161_v48, %v161_v48  ;;  %v1426_v63 = vld [vmem:[%s1650_s1 + $0x1a8] sm:$0xff]  ;;  %v1443_v25 = vld [vmem:[%s1650_s1 + $0x160] sm:$0xff]  ;;  %v1455_v29 = vld [vmem:[%s1650_s1 + $0x1d8] sm:$0xff] }
  0x12   :  { %563 = vmatpush.bf16.msra.mxu0 %v1250_v16  ;;  %1671 = vst [vmem:[#allocation3_spill] sm:$0xff] %v1443_v25  ;;  %v1450_v26 = vld [vmem:[%s1650_s1 + $0x1a0] sm:$0xff]  ;;  %v1460_v33 = vld [vmem:[%s1650_s1 + $0x118] sm:$0xff]  ;;  %v20_v39 = vld [vmem:[%s1651_s0 + $0x28] sm:$0xff] }
  0x13   :  { %576 = vmatpush.bf16.msra.mxu1 %v1255_v17  ;;  %1672 = vst [vmem:[#allocation4_spill] sm:$0xff] %v1450_v26  ;;  %v1465_v34 = vld [vmem:[%s1650_s1 + $0x158] sm:$0xff]  ;;  %v19_v38 = vld [vmem:[%s1651_s0 + $0x20] sm:$0xff]  ;;  %v1485_v42 = vld [vmem:[%s1650_s1 + $0x1d0] sm:$0xff] }
  0x14   :  { %589 = vmatpush.bf16.msra.mxu2 %v1262_v18  ;;  %1673 = vst [vmem:[#allocation5_spill] sm:$0xff] %v1455_v29  ;;  %v1472_v35 = vld [vmem:[%s1650_s1 + $0x198] sm:$0xff]  ;;  %v21_v43 = vld [vmem:[%s1651_s0 + $0x30] sm:$0xff]  ;;  %v1493_v47 = vpack.c.bf16 %v20_v39, %v19_v38 }
  0x15   :  { %602 = vmatpush.bf16.msra.mxu3 %v1267_v19  ;;  %1674 = vst [vmem:[#allocation6_spill] sm:$0xff] %v1460_v33  ;;  %v22_v44 = vld [vmem:[%s1651_s0 + $0x38] sm:$0xff]  ;;  %v1500_v48 = vld [vmem:[%s1650_s1 + $0x110] sm:$0xff] }
  0x16   :  { %564 = vmatpush.bf16.msra.mxu0 %v1278_v22  ;;  %1675 = vst [vmem:[#allocation7_spill] sm:$0xff] %v1465_v34 }
  0x17   :  { %577 = vmatpush.bf16.msra.mxu1 %v1285_v23  ;;  %1676 = vst [vmem:[#allocation8_spill] sm:$0xff] %v1472_v35 }
  0x18   :  { %590 = vmatpush.bf16.msra.mxu2 %v1300_v27  ;;  %1677 = vst [vmem:[#allocation9_spill] sm:$0xff] %v1485_v42 }
  0x19   :  { %603 = vmatpush.bf16.msra.mxu3 %v1305_v28  ;;  %1678 = vst [vmem:[#allocation10_spill] sm:$0xff] %v1500_v48 }
  0x1a   :  { %565 = vmatpush.bf16.msra.mxu0 %v1317_v31 }
  0x1b   :  { %578 = vmatpush.bf16.msra.mxu1 %v1322_v32 }
  0x1c   :  { %591 = vmatpush.bf16.msra.mxu2 %v1331_v36 }
  0x1d   :  { %604 = vmatpush.bf16.msra.mxu3 %v1336_v37 }
  0x1e   :  { %566 = vmatpush.bf16.msra.mxu0 %v1345_v40 }
  0x1f   :  { %579 = vmatpush.bf16.msra.mxu1 %v1350_v41 }
  0x20   :  { %592 = vmatpush.bf16.msra.mxu2 %v1357_v45 }
  0x21   :  { %605 = vmatpush.bf16.msra.mxu3 %v1362_v46  ;;  %567 = vmatmul.bf16.vlgmr.msra.gmra.mxu0 %v168_v54  ;;  %v1507_v54 = vpack.c.bf16 %v22_v44, %v21_v43 }
  0x22   :  { %611 = vmatpush.bf16.msrb.mxu0 %v1367_v49  ;;  %580 = vmatmul.bf16.vlgmr.msra.gmra.mxu1 %v169_v56  ;;  %v1519_v56 = vld [vmem:[%s1650_s1 + $0x1c8] sm:$0xff] }
  0x23   :  { %624 = vmatpush.bf16.msrb.mxu1 %v1372_v50  ;;  %593 = vmatmul.bf16.vlgmr.msra.gmra.mxu2 %v170_v53  ;;  %v1505_v53 = vld [vmem:[%s1650_s1 + $0x150] sm:$0xff]  ;;  %1680 = vst [vmem:[#allocation12_spill] sm:$0xff] %v1507_v54 }
  0x24   :  { %637 = vmatpush.bf16.msrb.mxu2 %v1377_v51  ;;  %606 = vmatmul.bf16.vlgmr.msra.gmra.mxu3 %v171_v55  ;;  %1679 = vst [vmem:[#allocation11_spill] sm:$0xff] %v1505_v53  ;;  %v1514_v55 = vld [vmem:[%s1650_s1 + $0x190] sm:$0xff] }
  0x25   :  { %651 = vmatpush.bf16.msrb.mxu3 %v1381_v52  ;;  %1681 = vst [vmem:[#allocation13_spill] sm:$0xff] %v1514_v55 }
  0x26   :  { %612 = vmatpush.bf16.msrb.mxu0 %v1390_v57  ;;  %1682 = vst [vmem:[#allocation14_spill] sm:$0xff] %v1519_v56 }
  0x27   :  { %625 = vmatpush.bf16.msrb.mxu1 %v1395_v58 }
  0x28   :  { %638 = vmatpush.bf16.msrb.mxu2 %v1402_v59 }
  0x29   :  { %652 = vmatpush.bf16.msrb.mxu3 %v1407_v60 }
  0x2a   :  { %613 = vmatpush.bf16.msrb.mxu0 %v1414_v61 }
  0x2b   :  { %626 = vmatpush.bf16.msrb.mxu1 %v1419_v62 }
  0x2c   :  { %639 = vmatpush.bf16.msrb.mxu2 %v1426_v63 }
  0x2d   :  { %653 = vmatpush.bf16.msrb.mxu3 %v1431_v20 }
  0x2e   :  { %614 = vmatpush.bf16.msrb.mxu0 %v1438_v21 }
  0x2f   :  { %627 = vmatpush.bf16.msrb.mxu1 %v1443_v25 }
  0x30   :  { %640 = vmatpush.bf16.msrb.mxu2 %v1450_v26  ;;  %v159_v26 = vunpack.c.h.bf16 %v1507_v54 }
  0x31   :  { %654 = vmatpush.bf16.msrb.mxu3 %v1455_v29  ;;  %v158_v29 = vunpack.c.l.bf16 %v1507_v54 }
  0x32   :  { %615 = vmatpush.bf16.msrb.mxu0 %v1460_v33  ;;  %v157_v33 = vunpack.c.h.bf16 %v1493_v47  ;;  %v167_v20 = vsub.f32 %v22_v44, %v159_v26 }
  0x33   :  { %628 = vmatpush.bf16.msrb.mxu1 %v1465_v34  ;;  %v156_v34 = vunpack.c.l.bf16 %v1493_v47  ;;  %v166_v54 = vsub.f32 %v21_v43, %v158_v29 }
  0x34   :  { %641 = vmatpush.bf16.msrb.mxu2 %v1472_v35  ;;  %v1532_v35 = vld [vmem:[%s1650_s1 + $0x148] sm:$0xff]  ;;  %v175_v29 = vpack.c.bf16 %v167_v20, %v167_v20 }
  0x35   :  { %655 = vmatpush.bf16.msrb.mxu3 %v1485_v42  ;;  %v1527_v42 = vld [vmem:[%s1650_s1 + $0x108] sm:$0xff]  ;;  %1684 = vst [vmem:[#allocation16_spill] sm:$0xff] %v1532_v35  ;;  %v164_v25 = vsub.f32 %v19_v38, %v156_v34  ;;  %v1566_v34 = vld [vmem:[%s1650_s1 + $0x180] sm:$0xff]  ;;  %v165_v38 = vsub.f32 %v20_v39, %v157_v33 }
  0x36   :  { %616 = vmatpush.bf16.msrb.mxu0 %v1500_v48  ;;  %1683 = vst [vmem:[#allocation15_spill] sm:$0xff] %v1527_v42  ;;  %v1546_v48 = vld [vmem:[%s1650_s1 + $0x1c0] sm:$0xff] }
  0x37   :  { %629 = vmatpush.bf16.msrb.mxu1 %v1505_v53  ;;  %v1541_v53 = vld [vmem:[%s1650_s1 + $0x188] sm:$0xff]  ;;  %v173_v26 = vpack.c.bf16 %v165_v38, %v165_v38 }
  0x38   :  { %642 = vmatpush.bf16.msrb.mxu2 %v1514_v55  ;;  %v1559_v55 = vld [vmem:[%s1650_s1 + $0x140] sm:$0xff] }
  0x39   :  { %656 = vmatpush.bf16.msrb.mxu3 %v1519_v56  ;;  %v1554_v56 = vld [vmem:[%s1650_s1 + $0x100] sm:$0xff] }
  0x3a   :  { %617 = vmatpush.bf16.msrb.mxu0 %v1527_v42  ;;  %v174_v42 = vpack.c.bf16 %v166_v54, %v166_v54 }
  0x3b   :  { %630 = vmatpush.bf16.msrb.mxu1 %v1532_v35  ;;  %v172_v35 = vpack.c.bf16 %v164_v25, %v164_v25 }
  0x3c   :  { %643 = vmatpush.bf16.msrb.mxu2 %v1541_v53 }
  0x3d   :  { %657 = vmatpush.bf16.msrb.mxu3 %v1546_v48 }
  0x3e   :  { %618 = vmatpush.bf16.msrb.mxu0 %v1554_v56 }
  0x3f   :  { %631 = vmatpush.bf16.msrb.mxu1 %v1559_v55 }
  0x40   :  { %644 = vmatpush.bf16.msrb.mxu2 %v1566_v34  ;;  %1067 = vmatmul.msk.bf16.vlgmr.msrb.gmra.mxu3 %vm551_vm1, %v175_v29 }
  0x41   :  { %693 = vmatpush.bf16.msra.mxu3 %v1156_v0  ;;  %619 = vmatmul.bf16.vlgmr.msrb.gmra.mxu0 %v172_v35  ;;  %v667_v0 = vunpack.c.l.b16 %v1310_v30 }
  0x42   :  { %706 = vmatpush.bf16.msra.mxu0 %v1161_v1  ;;  %632 = vmatmul.bf16.vlgmr.msrb.gmra.mxu1 %v173_v26 }
  0x43   :  { %719 = vmatpush.bf16.msra.mxu1 %v1166_v2  ;;  %645 = vmatmul.bf16.vlgmr.msrb.gmra.mxu2 %v174_v42  ;;  %v675_v1 = vpack.c.b16 %v667_v0, %v667_v0  ;;  %v668_v2 = vunpack.c.h.b16 %v1310_v30  ;;  %v1699_v30 = vld [vmem:[#allocation16_spill] sm:$0xff] }
  0x44   :  { %732 = vmatpush.bf16.msra.mxu2 %v1171_v3  ;;  %v669_v3 = vunpack.c.l.b16 %v1287_v24 }
  0x45   :  { %694 = vmatpush.bf16.msra.mxu3 %v1178_v4  ;;  %v670_v4 = vunpack.c.h.b16 %v1287_v24  ;;  %v1697_v24 = vld [vmem:[#allocation13_spill] sm:$0xff] }
  0x46   :  { %707 = vmatpush.bf16.msra.mxu0 %v1183_v5  ;;  %v676_v5 = vpack.c.b16 %v668_v2, %v668_v2 }
  0x47   :  { %720 = vmatpush.bf16.msra.mxu1 %v1190_v6  ;;  %v677_v6 = vpack.c.b16 %v669_v3, %v669_v3 }
  0x48   :  { %733 = vmatpush.bf16.msra.mxu2 %v1195_v7  ;;  %v678_v7 = vpack.c.b16 %v670_v4, %v670_v4 }
  0x49   :  { %695 = vmatpush.bf16.msra.mxu3 %v1202_v8  ;;  %v1685_v8 = vld [vmem:[#allocation2_spill] sm:$0xff] }
  0x4a   :  { %708 = vmatpush.bf16.msra.mxu0 %v1207_v9  ;;  %v1686_v9 = vld [vmem:[#allocation3_spill] sm:$0xff] }
  0x4b   :  { %721 = vmatpush.bf16.msra.mxu1 %v1214_v10  ;;  %v1687_v10 = vld [vmem:[#allocation6_spill] sm:$0xff] }
  0x4c   :  { %734 = vmatpush.bf16.msra.mxu2 %v1219_v11  ;;  %v1688_v11 = vld [vmem:[#allocation4_spill] sm:$0xff] }
  0x4d   :  { %696 = vmatpush.bf16.msra.mxu3 %v1226_v12  ;;  %v1689_v12 = vld [vmem:[#allocation5_spill] sm:$0xff] }
  0x4e   :  { %709 = vmatpush.bf16.msra.mxu0 %v1231_v13  ;;  %v1690_v13 = vld [vmem:[#allocation7_spill] sm:$0xff] }
  0x4f   :  { %722 = vmatpush.bf16.msra.mxu1 %v1238_v14  ;;  %v1691_v14 = vld [vmem:[#allocation10_spill] sm:$0xff] }
  0x50   :  { %735 = vmatpush.bf16.msra.mxu2 %v1243_v15  ;;  %v1692_v15 = vld [vmem:[#allocation8_spill] sm:$0xff] }
  0x51   :  { %697 = vmatpush.bf16.msra.mxu3 %v1250_v16  ;;  %v1693_v16 = vld [vmem:[#allocation9_spill] sm:$0xff] }
  0x52   :  { %710 = vmatpush.bf16.msra.mxu0 %v1255_v17  ;;  %v1694_v17 = vld [vmem:[#allocation11_spill] sm:$0xff] }
  0x53   :  { %723 = vmatpush.bf16.msra.mxu1 %v1262_v18  ;;  %v671_v18 = vunpack.c.l.b16 %v1493_v47 }
  0x54   :  { %736 = vmatpush.bf16.msra.mxu2 %v1267_v19  ;;  %v1695_v19 = vld [vmem:[#allocation15_spill] sm:$0xff] }
  0x55   :  { %698 = vmatpush.bf16.msra.mxu3 %v1278_v22  ;;  %v1696_v22 = vld [vmem:[#allocation12_spill] sm:$0xff] }
  0x56   :  { %711 = vmatpush.bf16.msra.mxu0 %v1285_v23  ;;  %v674_v23 = vunpack.c.h.b16 %v1696_v22 }
  0x57   :  { %724 = vmatpush.bf16.msra.mxu1 %v1300_v27  ;;  %v1698_v27 = vld [vmem:[#allocation14_spill] sm:$0xff] }
  0x58   :  { %737 = vmatpush.bf16.msra.mxu2 %v1305_v28  ;;  %v672_v28 = vunpack.c.h.b16 %v1493_v47  ;;  %v797_v47 = vld [vmem:[%s1652_s2] sm:$0xff] }
  0x59   :  { %699 = vmatpush.bf16.msra.mxu3 %v1317_v31  ;;  %v679_v31 = vpack.c.b16 %v671_v18, %v671_v18  ;;  %1131 = vrcp.f32 %v797_v47  ;;  %vm803_vm2 = vweird.f32 %v797_v47 }
  0x5a   :  { %712 = vmatpush.bf16.msra.mxu0 %v1322_v32  ;;  %v682_v32 = vpack.c.b16 %v674_v23, %v674_v23 }
  0x5b   :  { %725 = vmatpush.bf16.msra.mxu1 %v1331_v36  ;;  %v673_v36 = vunpack.c.l.b16 %v1696_v22 }
  0x5c   :  { %738 = vmatpush.bf16.msra.mxu2 %v1336_v37  ;;  %v680_v37 = vpack.c.b16 %v672_v28, %v672_v28 }
  0x5d   :  { %700 = vmatpush.bf16.msra.mxu3 %v1345_v40  ;;  %v681_v40 = vpack.c.b16 %v673_v36, %v673_v36 }
  0x5e   :  { %713 = vmatpush.bf16.msra.mxu0 %v1350_v41 }
  0x5f   :  { %726 = vmatpush.bf16.msra.mxu1 %v1357_v45  ;;  %v1132_v38 = vpop.eup %1131 }
  0x60   :  { %701 = vmatmul.bf16.vlgmr.msra.gmra.mxu3 %v675_v1  ;;  %739 = vmatpush.bf16.msra.mxu2 %v1362_v46  ;;  %v799_v1 = vmul.f32 %v1132_v38, %v797_v47  ;;  %vm804_vm3 = vweird.f32 %v1132_v38 }
  0x61   :  { %745 = vmatpush.bf16.msrb.mxu3 %v1367_v49  ;;  %714 = vmatmul.bf16.vlgmr.msra.gmra.mxu0 %v676_v5  ;;  %vm805_vm4 = vmor %vm803_vm2, %vm804_vm3 }
  0x62   :  { %758 = vmatpush.bf16.msrb.mxu0 %v1372_v50  ;;  %727 = vmatmul.bf16.vlgmr.msra.gmra.mxu1 %v677_v6  ;;  %v800_v3 = vsub.f32 1.0, %v799_v1 }
  0x63   :  { %771 = vmatpush.bf16.msrb.mxu1 %v1377_v51  ;;  %740 = vmatmul.bf16.vlgmr.msra.gmra.mxu2 %v678_v7  ;;  %v809_v7 = vand.u32 2147483648, %v797_v47 }
  0x64   :  { %785 = vmatpush.bf16.msrb.mxu2 %v1381_v52  ;;  %v801_v5 = vmul.f32 %v1132_v38, %v800_v3 }
  0x65   :  { %746 = vmatpush.bf16.msrb.mxu3 %v1390_v57 }
  0x66   :  { %759 = vmatpush.bf16.msrb.mxu0 %v1395_v58 }
  0x67   :  { %772 = vmatpush.bf16.msrb.mxu1 %v1402_v59 }
  0x68   :  { %786 = vmatpush.bf16.msrb.mxu2 %v1407_v60 }
  0x69   :  { %747 = vmatpush.bf16.msrb.mxu3 %v1414_v61 }
  0x6a   :  { %760 = vmatpush.bf16.msrb.mxu0 %v1419_v62 }
  0x6b   :  { %773 = vmatpush.bf16.msrb.mxu1 %v1426_v63 }
  0x6c   :  { %787 = vmatpush.bf16.msrb.mxu2 %v1685_v8 }
  0x6d   :  { %748 = vmatpush.bf16.msrb.mxu3 %v1438_v21 }
  0x6e   :  { %761 = vmatpush.bf16.msrb.mxu0 %v1686_v9 }
  0x6f   :  { %774 = vmatpush.bf16.msrb.mxu1 %v1688_v11  ;;  %v807_v11 = vand.u32 2147483647, %v797_v47 }
  0x70   :  { %788 = vmatpush.bf16.msrb.mxu2 %v1689_v12 }
  0x71   :  { %749 = vmatpush.bf16.msrb.mxu3 %v1687_v10  ;;  %v802_v10 = vadd.f32 %v1132_v38, %v801_v5  ;;  %vm808_vm5 = vcmp.eq.f32.partialorder %v807_v11, 8.507059e+37 }
  0x72   :  { %762 = vmatpush.bf16.msrb.mxu0 %v1690_v13 }
  0x73   :  { %775 = vmatpush.bf16.msrb.mxu1 %v1692_v15  ;;  %v810_v15 = vor.u32 1.1754944e-38, %v809_v7 }
  0x74   :  { %789 = vmatpush.bf16.msrb.mxu2 %v1693_v16 }
  0x75   :  { %750 = vmatpush.bf16.msrb.mxu3 %v1691_v14 }
  0x76   :  { %763 = vmatpush.bf16.msrb.mxu0 %v1694_v17  ;;  %v806_v17 = vsel %vm805_vm4, %v1132_v38, %v802_v10 }
  0x77   :  { %776 = vmatpush.bf16.msrb.mxu1 %v1697_v24  ;;  %v811_v22 = vsel %vm808_vm5, %v810_v15, %v806_v17 }
  0x78   :  { %790 = vmatpush.bf16.msrb.mxu2 %v1698_v27 }
  0x79   :  { %751 = vmatpush.bf16.msrb.mxu3 %v1695_v19 }
  0x7a   :  { %764 = vmatpush.bf16.msrb.mxu0 %v1699_v30 }
  0x7b   :  { %777 = vmatpush.bf16.msrb.mxu1 %v1541_v53 }
  0x7c   :  { %791 = vmatpush.bf16.msrb.mxu2 %v1546_v48 }
  0x7d   :  { %752 = vmatpush.bf16.msrb.mxu3 %v1554_v56 }
  0x7e   :  { %765 = vmatpush.bf16.msrb.mxu0 %v1559_v55 }
  0x7f   :  { %1068 = vmatmul.msk.bf16.vlgmr.msrb.gmra.mxu2 %vm551_vm1, %v682_v32  ;;  %778 = vmatpush.bf16.msrb.mxu1 %v1566_v34 }
  0x80   :  { %753 = vmatmul.bf16.vlgmr.msrb.gmra.mxu3 %v679_v31 }
  0x81   :  { %766 = vmatmul.bf16.vlgmr.msrb.gmra.mxu0 %v680_v37 }
  0x82   :  { %779 = vmatmul.bf16.vlgmr.msrb.gmra.mxu1 %v681_v40 }
  0x9e   :  { %v568_v41 = vpop.f32.mrf.mxu0 }
  0x9f   :  { %v581_v45 = vpop.f32.mrf.mxu1 }
  0xa0   :  { %v582_v46 = vadd.f32 %v581_v45, %v568_v41 }
  0xa6   :  { %v594_v49 = vpop.f32.mrf.mxu2  ;;  %v570_v52 = vpop.f32.mrf.mxu0 }
  0xa7   :  { %v595_v50 = vadd.f32 %v594_v49, %v582_v46  ;;  %v607_v51 = vpop.f32.mrf.mxu3  ;;  %v583_v58 = vpop.f32.mrf.mxu1 }
  0xa9   :  { %v608_v57 = vadd.f32 %v607_v51, %v595_v50 }
  0xae   :  { %v596_v59 = vpop.f32.mrf.mxu2 }
  0xaf   :  { %v609_v60 = vpop.f32.mrf.mxu3 }
  0xbe   :  { %v620_v61 = vpop.f32.mrf.mxu0 }
  0xbf   :  { %v633_v62 = vpop.f32.mrf.mxu1  ;;  %v621_v44 = vadd.f32 %v620_v61, %v608_v57 }
  0xc1   :  { %v634_v53 = vadd.f32 %v633_v62, %v621_v44 }
  0xc3   :  { %v659_v20 = vpop.f32.mrf.mxu3 }
  0xc6   :  { %v646_v63 = vpop.f32.mrf.mxu2  ;;  %v622_v21 = vpop.f32.mrf.mxu0 }
  0xc7   :  { %v635_v25 = vpop.f32.mrf.mxu1  ;;  %v647_v34 = vadd.f32 %v646_v63, %v634_v53 }
  0xc9   :  { %v660_v26 = vadd.f32 %v659_v20, %v647_v34 }
  0xcb   :  { %v661_v33 = vpop.f32.mrf.mxu3 }
  0xce   :  { %v648_v35 = vpop.f32.mrf.mxu2 }
  0xde   :  { %v715_v39 = vpop.f32.mrf.mxu0 }
  0xdf   :  { %v728_v42 = vpop.f32.mrf.mxu1 }
  0xe3   :  { %v702_v43 = vpop.f32.mrf.mxu3 }
  0xe4   :  { %v703_v0 = vadd.f32 %v702_v43, %v660_v26 }
  0xe6   :  { %v741_v48 = vpop.f32.mrf.mxu2  ;;  %v717_v54 = vpop.f32.mrf.mxu0  ;;  %v716_v2 = vadd.f32 %v715_v39, %v703_v0 }
  0xe7   :  { %v730_v55 = vpop.f32.mrf.mxu1 }
  0xe8   :  { %v729_v4 = vadd.f32 %v728_v42, %v716_v2 }
  0xea   :  { %v742_v8 = vadd.f32 %v741_v48, %v729_v4 }
  0xeb   :  { %v704_v56 = vpop.f32.mrf.mxu3 }
  0xee   :  { %v743_v29 = vpop.f32.mrf.mxu2 }
  0xfe   :  { %v767_v6 = vpop.f32.mrf.mxu0 }
  0xff   :  { %v780_v9 = vpop.f32.mrf.mxu1 }
 0x102   :  { %v793_v14 = vpop.f32.mrf.mxu2 }
 0x103   :  { %v754_v12 = vpop.f32.mrf.mxu3 }
 0x104   :  { %v755_v13 = vadd.f32 %v754_v12, %v742_v8 }
 0x106   :  { %v768_v16 = vadd.f32 %v767_v6, %v755_v13  ;;  %v769_v19 = vpop.f32.mrf.mxu0 }
 0x107   :  { %v782_v24 = vpop.f32.mrf.mxu1 }
 0x108   :  { %v781_v18 = vadd.f32 %v780_v9, %v768_v16 }
 0x10a   :  { %v794_v23 = vadd.f32 %v793_v14, %v781_v18  ;;  %v795_v30 = vpop.f32.mrf.mxu2 }
 0x10b   :  { %v756_v27 = vpop.f32.mrf.mxu3 }
 0x10c   :  { %v812_v28 = vmul.f32 %v811_v22, %v794_v23 }
 0x10e   :  { %814 = vst.msk [vmem:[%s1653_s3] sm:$0xff] %vm813_vm6, %v812_v28 }

</bundles_post_ra>
